<compile_context>
chip_gen: v7x
topology: tpu7x:2x2x1
jax: 0.10.0
libtpu: 0.0.40
codegen_flags: <defaults>
</compile_context>

<pallas_src>
import jax
import jax.numpy as jnp
from jax.experimental import pallas as pl
from jax.experimental.pallas import tpu as pltpu


def _pointwise_hswish_kernel(x_ref, w_ref, o_ref):
    # x_ref: (C_in+1, HW) with a trailing row of ones
    # w_ref: (C_out, C_in+1) with the bias folded into the last column
    # o_ref: (C_out, HW)
    v2 = jnp.dot(w_ref[...], x_ref[...], preferred_element_type=jnp.float32)
    v4 = jnp.clip(v2 + 3.0, 0.0, 6.0)
    # divide-by-6 -> constant multiply (stays in a VALU slot)
    o_ref[...] = (v2 * v4) * jnp.float32(1.0 / 6.0)


@jax.jit
def model_forward(x_nchw, w_conv, b_conv):
    """x_nchw: (1, 17, H, W) f32; w_conv: (4, 17, 1, 1); b_conv: (4,)."""
    n, c_in, h, w = x_nchw.shape
    c_out = w_conv.shape[0]
    hw = h * w

    # Flatten spatial dims; fold bias into the matmul via an augmented system.
    x2d = x_nchw.reshape(c_in, hw)                                   # (17, 1024)
    x_aug = jnp.concatenate(
        [x2d, jnp.ones((1, hw), dtype=x2d.dtype)], axis=0)           # (18, 1024)
    w_aug = jnp.concatenate(
        [w_conv.reshape(c_out, c_in).astype(jnp.float32),
         b_conv.reshape(c_out, 1).astype(jnp.float32)], axis=1)      # (4, 18)

    out2d = pl.pallas_call(
        _pointwise_hswish_kernel,
        out_shape=jax.ShapeDtypeStruct((c_out, hw), jnp.float32),
        in_specs=[
            pl.BlockSpec(memory_space=pltpu.MemorySpace.VMEM),
            pl.BlockSpec(memory_space=pltpu.MemorySpace.VMEM),
        ],
        out_specs=pl.BlockSpec(memory_space=pltpu.MemorySpace.VMEM),
    )(x_aug, w_aug)

    return out2d.reshape(n, c_out, h, w)


if __name__ == "__main__":
    key = jax.random.PRNGKey(0)
    k_x, k_w, k_b = jax.random.split(key, 3)

    # Shapes consistent with the module: x1 = (1, 17, 32, 32)
    x1 = jax.random.normal(k_x, (1, 17, 32, 32), dtype=jnp.float32)

    # Deterministic parameter init for the 1x1 pointwise conv (17 -> 4).
    fan_in = 17 * 1 * 1
    bound = 1.0 / (fan_in ** 0.5)
    w_conv = jax.random.uniform(k_w, (4, 17, 1, 1), dtype=jnp.float32,
                                minval=-bound, maxval=bound)
    b_conv = jax.random.uniform(k_b, (4,), dtype=jnp.float32,
                                minval=-bound, maxval=bound)

    out = model_forward(x1, w_conv, b_conv)
    out = jax.block_until_ready(out)

    # Lightweight self-check against a pure-JAX reference.
    v2_ref = jnp.einsum("oc,nchw->nohw", w_conv.reshape(4, 17), x1) \
             + b_conv.reshape(1, 4, 1, 1)
    ref = v2_ref * jnp.clip(v2_ref + 3.0, 0.0, 6.0) / 6.0
    assert out.shape == (1, 4, 32, 32)
    assert jnp.allclose(out, ref, atol=1e-5, rtol=1e-5)

    print("KERNEL_OK")
</pallas_src>

<mosaic_0001>
module attributes {stable_mosaic.version = 11 : i64} {
  func.func @_pointwise_hswish_kernel(%arg0: memref<18x1024xf32, #tpu.memory_space<vmem>>, %arg1: memref<4x18xf32, #tpu.memory_space<vmem>>, %arg2: memref<4x1024xf32, #tpu.memory_space<vmem>>) attributes {dimension_semantics = [], scalar_prefetch = 0 : i64, scratch_operands = 0 : i64, tpu.core_type = #tpu.core_type<tc>} {
    %c0 = arith.constant 0 : index
    %c0_0 = arith.constant 0 : index
    %0 = vector.load %arg1[%c0, %c0_0] : memref<4x18xf32, #tpu.memory_space<vmem>>, vector<4x18xf32>
    %c0_1 = arith.constant 0 : index
    %c0_2 = arith.constant 0 : index
    %1 = vector.load %arg0[%c0_1, %c0_2] : memref<18x1024xf32, #tpu.memory_space<vmem>>, vector<18x1024xf32>
    %cst = arith.constant dense<0.000000e+00> : vector<4x1024xf32>
    %2 = tpu.matmul %0, %1, %cst {dimension_numbers = #tpu.dot_dimension_numbers<[1], [0], [0], [1], [0, 0, 1, 1], [], []>} : vector<4x18xf32>, vector<18x1024xf32>, vector<4x1024xf32> -> vector<4x1024xf32>
    %cst_3 = arith.constant 3.000000e+00 : f32
    %3 = vector.broadcast %cst_3 : f32 to vector<4x1024xf32>
    %4 = arith.addf %2, %3 : vector<4x1024xf32>
    %cst_4 = arith.constant 0.000000e+00 : f32
    %cst_5 = arith.constant 6.000000e+00 : f32
    %5 = vector.broadcast %cst_4 : f32 to vector<4x1024xf32>
    %6 = arith.maximumf %5, %4 : vector<4x1024xf32>
    %7 = vector.broadcast %cst_5 : f32 to vector<4x1024xf32>
    %8 = arith.minimumf %7, %6 : vector<4x1024xf32>
    %9 = arith.mulf %2, %8 : vector<4x1024xf32>
    %cst_6 = arith.constant 0.166666672 : f32
    %10 = vector.broadcast %cst_6 : f32 to vector<4x1024xf32>
    %11 = arith.mulf %9, %10 : vector<4x1024xf32>
    %c0_7 = arith.constant 0 : index
    %c0_8 = arith.constant 0 : index
    %12 = vector.load %arg2[%c0_7, %c0_8] : memref<4x1024xf32, #tpu.memory_space<vmem>>, vector<4x1024xf32>
    tpu.vector_store %arg2[%c0_7, %c0_8], %11 {strides = array<i32>} : memref<4x1024xf32, #tpu.memory_space<vmem>>, vector<4x1024xf32>,
    return
  }
}

</mosaic_0001>

<bundles_post_ra>
// kernel: model_forward.1
= control target key start
LH: loop header
LB: loop body
LE: loop exit
PB: predicated region body
PF: predicated region fallthrough
CT: control target
= control target key end

     0   :  { %v442_v3 = vmov 0.0   ;;  %vm40_vm0 = vcmask 1041408   ;;  %vm36_vm1 = vcmask 146432   ;;  %s557_s0 = inlined_call_operand.vmem [shape: f32[18,1024], index: 0, kind: input, shape index: {}]   ;;  %s558_s1 = inlined_call_operand.vmem [shape: f32[4,18], index: 1, kind: input, shape index: {}]   ;;  %s559_s2 = inlined_call_operand.vmem [shape: f32[4,1024], index: 2, kind: output, shape index: {}]  }
   0x1   :  { %v13_v0 = vld [vmem:[%s557_s0 + $0x8] sm:$0xff]  ;;  %v15_v2 = vld [vmem:[%s557_s0 + $0x18] sm:$0xff]  ;;  %129 = vmatprep.mubr.f32.mxu0 %v442_v3  ;;  %200 = vmatprep.mubr.f32.mxu1 %v442_v3  ;;  %v12_v6 = vld [vmem:[%s557_s0] sm:$0xff] }
   0x2   :  { %v21_v1 = vld [vmem:[%s557_s0 + $0x48] sm:$0xff]  ;;  %v23_v5 = vld [vmem:[%s557_s0 + $0x58] sm:$0xff]  ;;  %v20_v7 = vld [vmem:[%s557_s0 + $0x40] sm:$0xff] }
   0x3   :  { %v425_v4 = vpack.c.bf16 %v21_v1, %v13_v0  ;;  %v429_v8 = vpack.c.bf16 %v23_v5, %v15_v2  ;;  %v427_v9 = vpack.c.bf16 %v20_v7, %v12_v6  ;;  %v14_v10 = vld [vmem:[%s557_s0 + $0x10] sm:$0xff]  ;;  %v29_v12 = vld [vmem:[%s557_s0 + $0x88] sm:$0x3]  ;;  %v31_v14 = vld [vmem:[%s557_s0 + $0x98] sm:$0x3] }
   0x4   :  { %v22_v11 = vld [vmem:[%s557_s0 + $0x50] sm:$0xff]  ;;  %v28_v15 = vld [vmem:[%s557_s0 + $0x80] sm:$0x3]  ;;  %v17_v18 = vld [vmem:[%s557_s0 + $0x28] sm:$0xff] }
   0x5   :  { %426 = vmatprep.subr.bf16.mxu0 %v425_v4  ;;  %v431_v13 = vpack.c.bf16 %v22_v11, %v14_v10  ;;  %430 = vmatprep.subr.bf16.mxu1 %v429_v8  ;;  %v30_v16 = vld [vmem:[%s557_s0 + $0x90] sm:$0x3]  ;;  %v11_v17 = vld [vmem:[%s558_s1] sm:$0xf]  ;;  %v25_v19 = vld [vmem:[%s557_s0 + $0x68] sm:$0xff] }
   0x6   :  { %428 = vmatpush1.bf16.msra.mxu0 %v427_v9  ;;  %v19_v20 = vld [vmem:[%s557_s0 + $0x38] sm:$0xff]  ;;  %v16_v22 = vld [vmem:[%s557_s0 + $0x20] sm:$0xff]  ;;  %v433_v23 = vpack.c.bf16 %v25_v19, %v17_v18  ;;  %v18_v25 = vld [vmem:[%s557_s0 + $0x30] sm:$0xff] }
   0x7   :  { %432 = vmatpush1.bf16.msra.mxu1 %v431_v13  ;;  %413 = vmatprep.subr.msk.mxu0 %vm40_vm0, %v29_v12  ;;  %v27_v21 = vld [vmem:[%s557_s0 + $0x78] sm:$0xff]  ;;  %v24_v24 = vld [vmem:[%s557_s0 + $0x60] sm:$0xff]  ;;  %v26_v26 = vld [vmem:[%s557_s0 + $0x70] sm:$0xff] }
   0x8   :  { %416 = vmatprep.subr.msk.mxu1 %vm40_vm0, %v31_v14  ;;  %v437_v27 = vpack.c.bf16 %v27_v21, %v19_v20  ;;  %v435_v28 = vpack.c.bf16 %v24_v24, %v16_v22  ;;  %v439_v29 = vpack.c.bf16 %v26_v26, %v18_v25  ;;  %v33_v30 = vld [vmem:[%s557_s0 + $0xa8] sm:$0x3]  ;;  %v35_v31 = vld [vmem:[%s557_s0 + $0xb8] sm:$0x3]  ;;  %v32_v32 = vld [vmem:[%s557_s0 + $0xa0] sm:$0x3] }
   0x9   :  { %v34_v33 = vld [vmem:[%s557_s0 + $0xb0] sm:$0x3] }
   0xa   :  { %414 = vmatpush1.msk.msra.mxu0 %vm40_vm0, %v28_v15 }
   0xb   :  { %417 = vmatpush1.msk.msra.mxu1 %vm40_vm0, %v30_v16  ;;  %415 = vmatmul.mubr.msk.f32.vlgmr.msra.gmra.mrb[0].mxu0 %vm36_vm1, %v11_v17 }
   0xc   :  { %418 = vmatmul.mubr.msk.f32.vlgmr.msra.gmra.mrb[0].mxu1 %vm36_vm1, %v11_v17  ;;  %434 = vmatprep.subr.bf16.mxu0 %v433_v23 }
   0xd   :  { %438 = vmatprep.subr.bf16.mxu1 %v437_v27  ;;  %436 = vmatpush1.bf16.msra.mxu0 %v435_v28 }
   0xe   :  { %440 = vmatpush1.bf16.msra.mxu1 %v439_v29  ;;  %419 = vmatprep.subr.msk.mxu0 %vm40_vm0, %v33_v30 }
   0xf   :  { %422 = vmatprep.subr.msk.mxu1 %vm40_vm0, %v35_v31  ;;  %271 = vmatprep.mubr.f32.mxu0 %v442_v3 }
  0x10   :  { %342 = vmatprep.mubr.f32.mxu1 %v442_v3 }
  0x11   :  { %420 = vmatpush1.msk.msra.mxu0 %vm40_vm0, %v32_v32 }
  0x12   :  { %423 = vmatpush1.msk.msra.mxu1 %vm40_vm0, %v34_v33  ;;  %421 = vmatmul.mubr.msk.f32.vlgmr.msra.gmra.mrb[2].mxu0 %vm36_vm1, %v11_v17 }
  0x13   :  { %424 = vmatmul.mubr.msk.f32.vlgmr.msra.gmra.mrb[2].mxu1 %vm36_vm1, %v11_v17 }
  0xde   :  { %v131_v34 = vpop.f32.mrb[0].mxu0 }
  0xdf   :  { %v349_v35 = vadd.f32 3.0, %v131_v34  ;;  %v202_v36 = vpop.f32.mrb[0].mxu1  ;;  %v133_v37 = vpop.f32.mrb[1].mxu0 }
  0xe0   :  { %v351_v38 = vadd.f32 3.0, %v202_v36  ;;  %v350_v39 = vadd.f32 3.0, %v133_v37  ;;  %v204_v40 = vpop.f32.mrb[1].mxu1 }
  0xe1   :  { %v357_v41 = vmax.f32 %v349_v35, 0.0  ;;  %v352_v42 = vadd.f32 3.0, %v204_v40 }
  0xe2   :  { %v359_v43 = vmax.f32 %v351_v38, 0.0  ;;  %v358_v44 = vmax.f32 %v350_v39, 0.0 }
  0xe3   :  { %v365_v45 = vmin.f32 %v357_v41, 6.0  ;;  %v360_v46 = vmax.f32 %v352_v42, 0.0 }
  0xe4   :  { %v367_v47 = vmin.f32 %v359_v43, 6.0  ;;  %v366_v48 = vmin.f32 %v358_v44, 6.0 }
  0xe5   :  { %v373_v49 = vmul.f32 %v365_v45, %v131_v34  ;;  %v368_v50 = vmin.f32 %v360_v46, 6.0  ;;  %v273_v51 = vpop.f32.mrb[2].mxu0 }
  0xe6   :  { %v375_v52 = vmul.f32 %v367_v47, %v202_v36  ;;  %v374_v53 = vmul.f32 %v366_v48, %v133_v37  ;;  %v353_v54 = vadd.f32 3.0, %v273_v51  ;;  %v344_v55 = vpop.f32.mrb[2].mxu1  ;;  %v275_v56 = vpop.f32.mrb[3].mxu0 }
  0xe7   :  { %v381_v57 = vmul.f32 0.16666667, %v373_v49  ;;  %v376_v58 = vmul.f32 %v368_v50, %v204_v40  ;;  %v355_v59 = vadd.f32 3.0, %v344_v55  ;;  %v354_v60 = vadd.f32 3.0, %v275_v56  ;;  %v346_v61 = vpop.f32.mrb[3].mxu1 }
  0xe8   :  { %v383_v62 = vmul.f32 0.16666667, %v375_v52  ;;  %v382_v63 = vmul.f32 0.16666667, %v374_v53  ;;  %v361_v0 = vmax.f32 %v353_v54, 0.0  ;;  %v356_v1 = vadd.f32 3.0, %v346_v61 }
  0xe9   :  { %v384_v2 = vmul.f32 0.16666667, %v376_v58  ;;  %v363_v3 = vmax.f32 %v355_v59, 0.0  ;;  %v362_v4 = vmax.f32 %v354_v60, 0.0 }
  0xea   :  { %v397_v5 = vcombine.low %v381_v57, %v382_v63  ;;  %v369_v6 = vmin.f32 %v361_v0, 6.0  ;;  %v364_v7 = vmax.f32 %v356_v1, 0.0 }
  0xeb   :  { %v398_v8 = vcombine.low %v383_v62, %v384_v2  ;;  %v371_v9 = vmin.f32 %v363_v3, 6.0  ;;  %v370_v10 = vmin.f32 %v362_v4, 6.0 }
  0xec   :  { %405 = vst [vmem:[%s559_s2] sm:$0xff] %v397_v5  ;;  %v377_v11 = vmul.f32 %v369_v6, %v273_v51  ;;  %v372_v12 = vmin.f32 %v364_v7, 6.0 }
  0xed   :  { %406 = vst [vmem:[%s559_s2 + $0x8] sm:$0xff] %v398_v8  ;;  %v379_v13 = vmul.f32 %v371_v9, %v344_v55  ;;  %v378_v14 = vmul.f32 %v370_v10, %v275_v56 }
  0xee   :  { %v385_v15 = vmul.f32 0.16666667, %v377_v11  ;;  %v380_v16 = vmul.f32 %v372_v12, %v346_v61 }
  0xef   :  { %v387_v17 = vmul.f32 0.16666667, %v379_v13  ;;  %v386_v18 = vmul.f32 0.16666667, %v378_v14 }
  0xf0   :  { %v388_v19 = vmul.f32 0.16666667, %v380_v16 }
  0xf1   :  { %v399_v20 = vcombine.low %v385_v15, %v386_v18 }
  0xf2   :  { %v400_v21 = vcombine.low %v387_v17, %v388_v19 }
  0xf3   :  { %407 = vst [vmem:[%s559_s2 + $0x10] sm:$0xff] %v399_v20 }
  0xf4   :  { %408 = vst [vmem:[%s559_s2 + $0x18] sm:$0xff] %v400_v21 }

</bundles_post_ra>
